<compile_context>
chip_gen: v7x
topology: tpu7x:2x2x1
jax: 0.10.0
libtpu: 0.0.40
codegen_flags: <defaults>
</compile_context>

<pallas_src>
import numpy as np
import jax
import jax.numpy as jnp
from jax import lax
from jax.experimental import pallas as pl
from jax.experimental.pallas import tpu as pltpu


_SEM_RING = 8  # max in-flight DMAs tracked per run-length group


def _compute_keep_indices(n: int, target: int) -> np.ndarray:
    """Exactly replicates ReduceFrame's index logic (trace time, shape-only)."""
    diff = n - target
    stride = n / diff
    frames_to_del = np.floor(np.arange(0, n, stride))
    if len(frames_to_del) != diff:            # Fitframe._fit_diff
        frames_to_del = frames_to_del[:-1]
    delete = {int(v) for v in frames_to_del}  # floor values are exact ints
    keep = [idx for idx in range(n) if idx not in delete]
    return np.asarray(keep, dtype=np.int64)


def _keep_runs(keep_idx: np.ndarray):
    """Group kept indices into contiguous (src_start, dst_start, length) runs."""
    runs = []
    i = 0
    m = len(keep_idx)
    while i < m:
        j = i
        while j + 1 < m and int(keep_idx[j + 1]) == int(keep_idx[j]) + 1:
            j += 1
        runs.append((int(keep_idx[i]), i, j - i + 1))
        i = j + 1
    return runs


def _make_periodic_kernel(col_start: int, col_len: int):
    """Exactly-periodic deletion: everything moves with ONE strided HBM DMA."""
    def kernel(x_ref, o_ref, sem):
        # x_ref: (diff, s*D) in HBM, o_ref: (diff, (s-1)*D) in HBM.
        cp = pltpu.make_async_copy(
            x_ref.at[:, pl.ds(col_start, col_len)], o_ref, sem.at[0])
        cp.start()
        cp.wait()
    return kernel


def _make_run_table_kernel(group_meta, align: int, ring: int):
    """General gather: loop over an SMEM run table, one flat 1-D DMA per run.

    group_meta: static tuple of (table_offset, run_count, run_len_elems), one
    entry per distinct run length.  Within a group every DMA moves the same
    byte count, so the semaphore-ring waits can use shape-only descriptors
    (only byte count / semaphore matter for a DMA wait).
    """
    def kernel(src_ref, dst_ref, x_ref, o_ref, sems):
        for off, count, le in group_meta:
            w = min(count, ring)   # ring depth actually used by this group

            @pl.loop(0, count)
            def _issue(i):
                slot = i % w

                @pl.when(i >= w)
                def _retire():
                    # Retire the copy issued `w` iterations ago on this slot.
                    pltpu.make_async_copy(
                        x_ref.at[pl.ds(0, le)],
                        o_ref.at[pl.ds(0, le)],
                        sems.at[slot],
                    ).wait()

                src = pl.multiple_of(src_ref[off + i], align)
                dst = pl.multiple_of(dst_ref[off + i], align)
                pltpu.make_async_copy(
                    x_ref.at[pl.ds(src, le)],
                    o_ref.at[pl.ds(dst, le)],
                    sems.at[slot],
                ).start()

            # Drain this group's outstanding copies (exactly one per used slot).
            for slot in range(w):
                pltpu.make_async_copy(
                    x_ref.at[pl.ds(0, le)],
                    o_ref.at[pl.ds(0, le)],
                    sems.at[slot],
                ).wait()
    return kernel


def reduce_frame(frames: jax.Array, target: int) -> jax.Array:
    """Pallas implementation of ReduceFrame.forward."""
    n = frames.shape[0]
    if n <= target:
        return frames

    keep_idx = _compute_keep_indices(n, target)
    n_keep = int(keep_idx.shape[0])
    rest = frames.shape[1:]
    if n_keep == 0:
        # All frames deleted — return an empty stack without launching a kernel.
        return frames[:0]

    d = int(np.prod(rest)) if rest else 1
    diff = n - target
    itemsize = np.dtype(frames.dtype).itemsize
    bytes_moved = 2 * n_keep * d * itemsize
    cost = pl.CostEstimate(flops=0, transcendentals=0, bytes_accessed=bytes_moved)

    runs = _keep_runs(keep_idx)

    # --- Fast path 0: single contiguous kept run -> one plain slice,
    # no custom-call launch, XLA already does this as one optimal copy.
    if len(runs) == 1:
        src, _, length = runs[0]
        return lax.slice_in_dim(frames, src, src + length, axis=0)

    # --- Fast path 1: exactly-periodic deletion (integer stride).  Frame 0 of
    # every period of `s` frames is dropped, so viewing the input as
    # (diff, s*D) and copying columns [D, s*D) gathers everything with a
    # single strided HBM->HBM DMA (coalesces O(diff) runs into 1 descriptor).
    if n % diff == 0:
        s = n // diff
        periodic = len(runs) == diff and all(
            r == (k * s + 1, k * (s - 1), s - 1) for k, r in enumerate(runs))
        if periodic:
            x2 = frames.reshape(diff, s * d)
            out2 = pl.pallas_call(
                _make_periodic_kernel(d, (s - 1) * d),
                out_shape=jax.ShapeDtypeStruct((diff, (s - 1) * d), frames.dtype),
                in_specs=[pl.BlockSpec(memory_space=pl.ANY)],
                out_specs=pl.BlockSpec(memory_space=pl.ANY),
                scratch_shapes=[pltpu.SemaphoreType.DMA((1,))],
                cost_estimate=cost,
            )(x2)
            return out2.reshape((n_keep,) + rest)

    # --- General path: SMEM run table + in-kernel DMA loop with a sem ring.
    if n * d >= 2**31 or n_keep * d >= 2**31:
        # TODO(synk): int32 element offsets would overflow beyond 2^31 elements;
        # fall back to a plain XLA gather for that (unrealistic) extreme.
        return jnp.take(frames, jnp.asarray(keep_idx, dtype=jnp.int32), axis=0)

    # Group runs by (static) length so every DMA within a group has one shape.
    groups = {}
    for src, dst, length in runs:
        groups.setdefault(length, []).append((src, dst))
    # TODO(synk): non-integer-stride inputs could coalesce further by grouping
    # equal-length *and* equal-gap runs into strided DMAs; the SMEM-table loop
    # below already keeps code size / semaphores O(1) in the number of runs.

    src_tab, dst_tab, group_meta = [], [], []
    for length in sorted(groups):
        entries = groups[length]
        group_meta.append((len(src_tab), len(entries), length * d))
        for src, dst in entries:
            src_tab.append(src * d)   # flat element offsets -> 1-D contiguous DMA
            dst_tab.append(dst * d)
    src_tab = jnp.asarray(np.asarray(src_tab, dtype=np.int32))
    dst_tab = jnp.asarray(np.asarray(dst_tab, dtype=np.int32))

    align = d & -d                    # largest power-of-two divisor of D
    x1 = frames.reshape((n * d,))     # lane-dense flat view; free in HBM

    out1 = pl.pallas_call(
        _make_run_table_kernel(tuple(group_meta), align, _SEM_RING),
        out_shape=jax.ShapeDtypeStruct((n_keep * d,), frames.dtype),
        grid_spec=pltpu.PrefetchScalarGridSpec(
            num_scalar_prefetch=2,                 # src/dst tables land in SMEM
            grid=(1,),
            in_specs=[pl.BlockSpec(memory_space=pl.ANY)],
            out_specs=pl.BlockSpec(memory_space=pl.ANY),
            scratch_shapes=[pltpu.SemaphoreType.DMA((_SEM_RING,))],
        ),
        cost_estimate=cost,
    )(src_tab, dst_tab, x1)
    return out1.reshape((n_keep,) + rest)


def reduce_frame_ref(frames: jax.Array, target: int) -> jax.Array:
    """Pure-JAX/NumPy reference for correctness check."""
    n = frames.shape[0]
    if n <= target:
        return frames
    keep_idx = _compute_keep_indices(n, target)
    if keep_idx.shape[0] == 0:
        return frames[:0]
    return frames[np.asarray(keep_idx)]


if __name__ == "__main__":
    key = jax.random.PRNGKey(0)
    k1, k2 = jax.random.split(key)

    # Small video clip: 16 frames of (C=4, H=16, W=16).
    frames = jax.random.normal(k1, (16, 4, 16, 16), dtype=jnp.float32)

    # 1) 16 -> 12: integer stride (4) -> exactly-periodic single strided DMA.
    out = jax.block_until_ready(reduce_frame(frames, 12))
    ref = reduce_frame_ref(frames, 12)
    assert out.shape == ref.shape, (out.shape, ref.shape)
    np.testing.assert_array_equal(np.asarray(out), np.asarray(ref))

    # 2) 16 -> 5: non-integer stride, singleton runs (fit in the sem ring)
    #    -> SMEM run-table path.
    out = jax.block_until_ready(reduce_frame(frames, 5))
    ref = reduce_frame_ref(frames, 5)
    assert out.shape == ref.shape, (out.shape, ref.shape)
    np.testing.assert_array_equal(np.asarray(out), np.asarray(ref))

    # 3) 64 -> 21: more runs than the semaphore ring -> exercises in-loop
    #    ring waits of the table path.
    frames64 = jax.random.normal(k2, (64, 4, 8, 8), dtype=jnp.float32)
    out = jax.block_until_ready(reduce_frame(frames64, 21))
    ref = reduce_frame_ref(frames64, 21)
    assert out.shape == ref.shape, (out.shape, ref.shape)
    np.testing.assert_array_equal(np.asarray(out), np.asarray(ref))

    # 4) 16 -> 15: single contiguous kept run -> plain slice, no kernel launch.
    out = jax.block_until_ready(reduce_frame(frames, 15))
    ref = reduce_frame_ref(frames, 15)
    assert out.shape == ref.shape, (out.shape, ref.shape)
    np.testing.assert_array_equal(np.asarray(out), np.asarray(ref))

    # 5) n <= target: pass-through.
    small = frames[:8]
    out = jax.block_until_ready(reduce_frame(small, 12))
    np.testing.assert_array_equal(np.asarray(out), np.asarray(small))

    print("KERNEL_OK")
</pallas_src>

<mosaic_0001>
module attributes {stable_mosaic.version = 11 : i64} {
  func.func @kernel(%arg0: memref<4x4096xf32, #tpu.memory_space<any>>, %arg1: memref<4x3072xf32, #tpu.memory_space<any>>, %arg2: memref<1x!tpu.dma_semaphore, #tpu.memory_space<semaphore_mem>>) attributes {dimension_semantics = [], scalar_prefetch = 0 : i64, scratch_operands = 1 : i64, tpu.core_type = #tpu.core_type<tc>} {
    %c0_i32 = arith.constant 0 : i32
    %c0_i32_0 = arith.constant 0 : i32
    %c1024_i32 = arith.constant 1024 : i32
    %0 = tpu.memref_slice %arg0[%c0_i32_0, %c1024_i32] : memref<4x4096xf32, #tpu.memory_space<any>> -> memref<4x3072xf32, #tpu.memory_space<any>>
    %1 = tpu.memref_slice %arg2[%c0_i32] : memref<1x!tpu.dma_semaphore, #tpu.memory_space<semaphore_mem>> -> memref<1x!tpu.dma_semaphore, #tpu.memory_space<semaphore_mem>>
    %2 = tpu.memref_squeeze %1 : memref<1x!tpu.dma_semaphore, #tpu.memory_space<semaphore_mem>> -> memref<!tpu.dma_semaphore, #tpu.memory_space<semaphore_mem>>
    tpu.enqueue_dma source(%0 : memref<4x3072xf32, #tpu.memory_space<any>>) target(%arg1 : memref<4x3072xf32, #tpu.memory_space<any>>) target_semaphore(%2 : memref<!tpu.dma_semaphore, #tpu.memory_space<semaphore_mem>>)
    %c0_i32_1 = arith.constant 0 : i32
    %c0_i32_2 = arith.constant 0 : i32
    %c1024_i32_3 = arith.constant 1024 : i32
    %3 = tpu.memref_slice %arg0[%c0_i32_2, %c1024_i32_3] : memref<4x4096xf32, #tpu.memory_space<any>> -> memref<4x3072xf32, #tpu.memory_space<any>>
    %4 = tpu.memref_slice %arg2[%c0_i32_1] : memref<1x!tpu.dma_semaphore, #tpu.memory_space<semaphore_mem>> -> memref<1x!tpu.dma_semaphore, #tpu.memory_space<semaphore_mem>>
    %5 = tpu.memref_squeeze %4 : memref<1x!tpu.dma_semaphore, #tpu.memory_space<semaphore_mem>> -> memref<!tpu.dma_semaphore, #tpu.memory_space<semaphore_mem>>
    tpu.wait_dma2 semaphore(%5 : memref<!tpu.dma_semaphore, #tpu.memory_space<semaphore_mem>>) src(%3 : memref<4x3072xf32, #tpu.memory_space<any>>) dst(%arg1 : memref<4x3072xf32, #tpu.memory_space<any>>)
    return
  }
}

</mosaic_0001>

<bundles_post_ra>
// kernel: tpu_custom_call.1
= control target key start
LH: loop header
LB: loop body
LE: loop exit
PB: predicated region body
PF: predicated region fallthrough
CT: control target
= control target key end

     0   :  { %s36_s9 = smov [#allocation2]   ;;  %s37_s10 = smov [#allocation3]   ;;  %s55_s0 = inlined_call_operand.hbm [shape: f32[4,4096], index: 0, kind: input, shape index: {}]   ;;  %s56_s1 = inlined_call_operand.hbm [shape: f32[4,3072], index: 1, kind: output, shape index: {}]  }
   0x1   :  { %s6_s8 = scalar_lea.hbm %s55_s0, 512  ;;  %s38_s11 = smov 0  }
   0x2   :  { %19 = dma.general %s6_s8, 1536, %s56_s1, %s36_s9, %s37_s10, [#allocation4], %s38_s11, 0  }
   0x3   :  { %34 = dma.done.wait [#allocation2], 1536 }
   0x4   :  { %35 = vsyncadd [#allocation2], 4294965760 }
   0x5   :  { %24 = vsyncmov [#allocation2] }
   0x8   :  { %s25_s14 = vpop.sfrf %24 }
   0x9   :  { %p30_p0 = scmp.ne.s32.totalorder %s25_s14, 0 }
   0xb   :  { %29 = shalt.err (%p30_p0)  }

</bundles_post_ra>
